<compile_context>
chip_gen: v6e
topology: v6e:2x2x1
jax: 0.10.0
libtpu: 0.0.40
codegen_flags: <defaults>
</compile_context>

<pallas_src>
import functools

import numpy as np
import jax
import jax.numpy as jnp
from jax.experimental import pallas as pl
from jax.experimental.pallas import tpu as pltpu


def _round_up(a, b):
    return (a + b - 1) // b * b


# ----------------------------------------------------------------------------
# Plain-JAX helpers: deterministic parameter init (curve2coef) + pure-JAX
# reference (correctness check / per-edge-grid fallback).
# ----------------------------------------------------------------------------
def extend_grid(grid, k):
    # grid: (S, G+1) -> (S, G+2k+1)
    h = (grid[:, -1:] - grid[:, :1]) / (grid.shape[1] - 1)
    for _ in range(k):
        grid = jnp.concatenate([grid[:, :1] - h, grid, grid[:, -1:] + h], axis=1)
    return grid


def b_batch(x_eval, grid, k):
    # x_eval: (S, batch), grid: (S, G+1) unextended -> (S, G+k, batch)
    g = extend_grid(grid, k)
    m = g.shape[1] - 1
    x_b = x_eval[:, None, :]
    g3 = g[:, :, None]
    B = jnp.where((x_b >= g3[:, :-1]) & (x_b < g3[:, 1:]), 1.0, 0.0)
    for kk in range(1, k + 1):
        nb = m - kk
        left = (x_b - g3[:, :nb]) / (g3[:, kk:kk + nb] - g3[:, :nb])
        right = (g3[:, kk + 1:kk + 1 + nb] - x_b) / (g3[:, kk + 1:kk + 1 + nb] - g3[:, 1:1 + nb])
        B = left * B[:, :nb] + right * B[:, 1:1 + nb]
    return B


def curve2coef(x_eval, y_eval, grid, k):
    mat = jnp.transpose(b_batch(x_eval, grid, k), (0, 2, 1))  # (S, batch, G+k)
    return jnp.einsum('sij,sj->si', jnp.linalg.pinv(mat), y_eval)


def kan_forward_ref(x, grid, coef, scale_base, scale_sp, mask, *, k, in_dim, out_dim):
    batch = x.shape[0]
    size = in_dim * out_dim
    xe = jnp.broadcast_to(x[:, None, :], (batch, out_dim, in_dim)).reshape(batch, size).T
    B = b_batch(xe, grid, k)
    spline = jnp.sum(coef[:, :, None] * B, axis=1)
    base = xe * jax.nn.sigmoid(xe)
    act = mask[:, None] * (scale_base[:, None] * base + scale_sp[:, None] * spline)
    y = act.reshape(out_dim, in_dim, batch).sum(axis=1).T
    preacts = jnp.broadcast_to(x[:, None, :], (batch, out_dim, in_dim))
    postspline = spline.T.reshape(batch, out_dim, in_dim)
    postacts = act.T.reshape(batch, out_dim, in_dim)
    return y, preacts, postacts, postspline


# ----------------------------------------------------------------------------
# Pallas kernel (shared-grid path).  One grid step = one input dim (ii,
# accumulation axis) x one out-row tile (si) x one batch-lane tile (bi).
# ----------------------------------------------------------------------------
def _kan_kernel(x_ref, knots_ref, inv_ref, coef_ref, msb_ref, mssp_ref,
                y_ref, *aux_refs, k, emit_aux):
    """Block shapes seen by the kernel:
         x_ref     (1, 1, TB)            x[:, i] for this batch tile (lanes = batch)
         knots_ref (1, m+1, 1)           extended knots for input dim i (shared over out_dim)
         inv_ref   (1, 2k, m, 1)         precomputed 1/denominator tables per level
         coef_ref  (1, 1, R, n_coef)     spline coefficients (lane-dense)
         msb_ref   (1, 1, R, 1)          mask * scale_base
         mssp_ref  (1, 1, R, 1)          mask * scale_sp
         y_ref     (R, TB)               accumulated over the in_dim grid axis
         aux_refs  2 x (1, 1, R, TB)     (postspline, postacts), only if emit_aux
    """
    @pl.when(pl.program_id(2) == 0)
    def _():
        y_ref[...] = jnp.zeros_like(y_ref)

    xi = x_ref[0]                 # (1, TB)
    g = knots_ref[0]              # (m+1, 1)
    inv = inv_ref[0]              # (2k, m, 1)
    m = g.shape[0] - 1            # extended intervals = G + 2k

    # Order-0 bases once per (input dim, batch tile): (m, TB).
    B = jnp.where((xi >= g[:-1]) & (xi < g[1:]), 1.0, 0.0)
    for kk in range(1, k + 1):
        nb = m - kk
        inv_l = inv[kk - 1, :nb]                 # (nb, 1) hoisted 1/(t_{j+k} - t_j)
        inv_r = inv[k + kk - 1, :nb]             # (nb, 1)
        left = (xi - g[:nb]) * inv_l             # (nb, TB)
        right = (g[kk + 1:kk + 1 + nb] - xi) * inv_r
        B = left * B[:nb] + right * B[1:1 + nb]
    # B: (n_coef, TB)

    coef = coef_ref[0, 0]                                     # (R, n_coef)
    spline = jnp.dot(coef, B, preferred_element_type=jnp.float32)   # MXU: (R, TB)
    base = xi * jax.nn.sigmoid(xi)                             # (1, TB), SiLU once
    act = msb_ref[0, 0] * base + mssp_ref[0, 0] * spline       # (R, TB)

    y_ref[...] += act
    if emit_aux:
        ps_ref, pa_ref = aux_refs
        ps_ref[0, 0] = spline.astype(ps_ref.dtype)
        pa_ref[0, 0] = act.astype(pa_ref.dtype)


# ----------------------------------------------------------------------------
# Wrapper: parameter regrouping, tiling and the pallas_call.
# ----------------------------------------------------------------------------
def kan_forward(x, grid, coef, scale_base, scale_sp, mask, *, k, in_dim, out_dim,
                return_aux=True, aux_dtype=jnp.float32):
    """KANLayer.forward.  x: (batch, in_dim) f32.
    Returns (y, preacts, postacts, postspline) (PyTorch shapes), or just y if
    return_aux=False (cuts ~2*in_dim x of HBM writeback)."""
    dt = jnp.float32
    batch = x.shape[0]
    num = grid.shape[1] - 1          # G
    m_ext = num + 2 * k              # extended intervals
    n_coef = num + k                 # number of B-spline bases

    # ---- shared-grid check (holds for pykan init and standard grid updates).
    # Needs concrete (parameter) grids; tracers fall back to the safe path.
    try:
        g_np = np.asarray(jax.device_get(grid)).reshape(out_dim, in_dim, num + 1)
        shared = bool(np.all(g_np == g_np[:1]))
    except Exception:
        shared = False
    if not shared:
        # TODO(synk): genuinely per-edge grids use the pure-JAX path; a per-edge
        # Pallas kernel (R-fold basis recursion) would be needed to accelerate it.
        outs = kan_forward_ref(x, grid, coef, scale_base, scale_sp, mask,
                               k=k, in_dim=in_dim, out_dim=out_dim)
        return outs if return_aux else outs[0]

    # ---- tile sizes: batch on lanes (multiple of 128), out rows in groups of 8.
    tb = min(512, _round_up(batch, 128))
    b_p = _round_up(batch, tb)
    r_tile = min(_round_up(out_dim, 8), 256)
    out_dim_p = _round_up(out_dim, r_tile)
    n_s = out_dim_p // r_tile
    n_b = b_p // tb

    # v7x has 2 TensorCores: try to expose >= 2 blocks on the parallel axes.
    if n_s * n_b < 2:
        if tb >= 256 and tb % 256 == 0:
            tb //= 2
            b_p = _round_up(batch, tb)
            n_b = b_p // tb
        else:
            r_half = _round_up(max(r_tile // 2, 8), 8)
            if r_half < r_tile:
                r_tile = r_half
                out_dim_p = _round_up(out_dim, r_tile)
                n_s = out_dim_p // r_tile

    # ---- per-input-dim knots + hoisted inverse denominators (tiny, done in XLA).
    grid_i = grid.astype(dt).reshape(out_dim, in_dim, num + 1)[0]   # (in_dim, G+1)
    knots = extend_grid(grid_i, k)                                  # (in_dim, m+1)
    inv_rows = max(2 * k, 1)
    inv_tab = jnp.zeros((in_dim, inv_rows, m_ext), dt)
    for kk in range(1, k + 1):
        nb = m_ext - kk
        den_l = knots[:, kk:kk + nb] - knots[:, :nb]
        den_r = knots[:, kk + 1:kk + 1 + nb] - knots[:, 1:1 + nb]
        inv_l = jnp.where(den_l == 0.0, 0.0, 1.0 / jnp.where(den_l == 0.0, 1.0, den_l))
        inv_r = jnp.where(den_r == 0.0, 0.0, 1.0 / jnp.where(den_r == 0.0, 1.0, den_r))
        inv_tab = inv_tab.at[:, kk - 1, :nb].set(inv_l)
        inv_tab = inv_tab.at[:, k + kk - 1, :nb].set(inv_r)
    knots_r = knots[..., None]             # (in_dim, m+1, 1)
    inv_r_tab = inv_tab[..., None]         # (in_dim, 2k, m, 1)

    # ---- per-edge parameters regrouped to the kernel layout (zero padding of
    #      extra out rows is safe: zero coef/scales -> zero contribution).
    def regroup_rows(a, c_last):
        a = a.astype(dt).reshape(out_dim, in_dim, -1)
        a = jnp.pad(a, ((0, out_dim_p - out_dim), (0, 0), (0, 0)))
        return a.transpose(1, 0, 2).reshape(in_dim, n_s, r_tile, c_last)

    coef_r = regroup_rows(coef, n_coef)                      # (in_dim, n_s, R, n_coef)
    msb_r = regroup_rows((mask * scale_base)[:, None], 1)    # (in_dim, n_s, R, 1)
    mssp_r = regroup_rows((mask * scale_sp)[:, None], 1)

    # x stays (in_dim, batch) — no out_dim-fold replication in HBM.
    x3 = jnp.pad(x.astype(dt).T, ((0, 0), (0, b_p - batch))).reshape(in_dim, 1, b_p)

    # ---- specs / shapes.
    y_struct = jax.ShapeDtypeStruct((out_dim_p, b_p), dt)
    aux_struct = jax.ShapeDtypeStruct((in_dim, n_s, r_tile, b_p), aux_dtype)
    y_spec = pl.BlockSpec((r_tile, tb), lambda si, bi, ii: (si, bi))
    aux_spec = pl.BlockSpec((1, 1, r_tile, tb), lambda si, bi, ii: (ii, si, 0, bi))
    in_specs = [
        pl.BlockSpec((1, 1, tb), lambda si, bi, ii: (ii, 0, bi)),
        pl.BlockSpec((1, m_ext + 1, 1), lambda si, bi, ii: (ii, 0, 0)),
        pl.BlockSpec((1, inv_rows, m_ext, 1), lambda si, bi, ii: (ii, 0, 0, 0)),
        pl.BlockSpec((1, 1, r_tile, n_coef), lambda si, bi, ii: (ii, si, 0, 0)),
        pl.BlockSpec((1, 1, r_tile, 1), lambda si, bi, ii: (ii, si, 0, 0)),
        pl.BlockSpec((1, 1, r_tile, 1), lambda si, bi, ii: (ii, si, 0, 0)),
    ]
    if return_aux:
        out_shape = (y_struct, aux_struct, aux_struct)
        out_specs = (y_spec, aux_spec, aux_spec)
    else:
        out_shape = y_struct
        out_specs = y_spec

    # ---- VMEM limit derived from the part (v7x: 64 MiB/TC vs 128 MiB on v5e/v6e).
    try:
        vmem_cap = pltpu.get_tpu_info().vmem_capacity_bytes
    except Exception:
        vmem_cap = 128 * 1024 * 1024
    vmem_limit = int(min(vmem_cap * 5 // 8, 64 * 1024 * 1024))

    outs = pl.pallas_call(
        functools.partial(_kan_kernel, k=k, emit_aux=return_aux),
        grid=(n_s, n_b, in_dim),
        in_specs=in_specs,
        out_specs=out_specs,
        out_shape=out_shape,
        compiler_params=pltpu.CompilerParams(
            dimension_semantics=("parallel", "parallel", "arbitrary"),
            vmem_limit_bytes=vmem_limit,
        ),
    )(x3, knots_r, inv_r_tab, coef_r, msb_r, mssp_r)
    # TODO(synk): for very large in_dim, block the accumulation axis (I_TILE
    # input dims per grid step) to amortize per-step overhead.

    if return_aux:
        y_arr, ps_arr, pa_arr = outs
    else:
        y_arr = outs

    y = y_arr[:out_dim, :batch].T                                   # (batch, out_dim)
    if not return_aux:
        return y

    # Slice padding away BEFORE transposing (less relayout traffic).
    ps = ps_arr.reshape(in_dim, out_dim_p, b_p)[:, :out_dim, :batch]
    pa = pa_arr.reshape(in_dim, out_dim_p, b_p)[:, :out_dim, :batch]
    postspline = ps.transpose(2, 1, 0).astype(dt)
    postacts = pa.transpose(2, 1, 0).astype(dt)
    preacts = jnp.broadcast_to(x.astype(dt)[:, None, :], (batch, out_dim, in_dim))
    return y, preacts, postacts, postspline


# ----------------------------------------------------------------------------
if __name__ == "__main__":
    # KANLayer(in_dim, out_dim, num, k) hyperparameters (small shapes).
    in_dim, out_dim, num, k = 4, 3, 5, 3
    noise_scale = 0.1
    batch = 8
    size = in_dim * out_dim

    key = jax.random.PRNGKey(0)
    kx, kn = jax.random.split(key)

    # Deterministic parameter init mirroring KANLayer.__init__.
    grid = jnp.broadcast_to(jnp.linspace(-1.0, 1.0, num + 1, dtype=jnp.float32),
                            (size, num + 1))
    noises = (jax.random.uniform(kn, (size, num + 1), jnp.float32) - 0.5) * noise_scale / num
    coef = curve2coef(grid, noises, grid, k)          # (size, num + k)
    scale_base = jnp.ones((size,), jnp.float32)
    scale_sp = jnp.ones((size,), jnp.float32)
    mask = jnp.ones((size,), jnp.float32)
    # TODO(synk): weight_sharing is identity (no lock()), so the grid/coef gather is a no-op here.

    x = jax.random.normal(kx, (batch, in_dim), jnp.float32)

    outs = kan_forward(x, grid, coef, scale_base, scale_sp, mask,
                       k=k, in_dim=in_dim, out_dim=out_dim)
    outs = jax.block_until_ready(outs)

    refs = kan_forward_ref(x, grid, coef, scale_base, scale_sp, mask,
                           k=k, in_dim=in_dim, out_dim=out_dim)

    for got, want, name in zip(outs, refs, ("y", "preacts", "postacts", "postspline")):
        assert got.shape == want.shape, (name, got.shape, want.shape)
        assert jnp.allclose(got, want, atol=1e-5, rtol=1e-5), name

    # y-only variant (no aux store streams) must agree as well.
    y_only = jax.block_until_ready(
        kan_forward(x, grid, coef, scale_base, scale_sp, mask,
                    k=k, in_dim=in_dim, out_dim=out_dim, return_aux=False))
    assert jnp.allclose(y_only, refs[0], atol=1e-5, rtol=1e-5)

    print("KERNEL_OK")
</pallas_src>

<mosaic_0001>
module attributes {stable_mosaic.version = 11 : i64} {
  func.func @_kan_kernel(%arg0: i32, %arg1: i32, %arg2: i32, %arg3: memref<1x1x128xf32, #tpu.memory_space<vmem>>, %arg4: memref<1x12x1xf32, #tpu.memory_space<vmem>>, %arg5: memref<1x6x11x1xf32, #tpu.memory_space<vmem>>, %arg6: memref<1x1x8x8xf32, #tpu.memory_space<vmem>>, %arg7: memref<1x1x8x1xf32, #tpu.memory_space<vmem>>, %arg8: memref<1x1x8x1xf32, #tpu.memory_space<vmem>>, %arg9: memref<8x128xf32, #tpu.memory_space<vmem>>, %arg10: memref<1x1x8x128xf32, #tpu.memory_space<vmem>>, %arg11: memref<1x1x8x128xf32, #tpu.memory_space<vmem>>) attributes {dimension_semantics = [#tpu.dimension_semantics<parallel>, #tpu.dimension_semantics<parallel>, #tpu.dimension_semantics<arbitrary>], iteration_bounds = array<i64: 1, 1, 4>, scalar_prefetch = 0 : i64, scratch_operands = 0 : i64, tpu.core_type = #tpu.core_type<tc>, window_params = [{transform_indices = @transform_0, window_bounds = array<i64: 1, 1, 128>}, {transform_indices = @transform_1, window_bounds = array<i64: 1, 12, 1>}, {transform_indices = @transform_2, window_bounds = array<i64: 1, 6, 11, 1>}, {transform_indices = @transform_3, window_bounds = array<i64: 1, 1, 8, 8>}, {transform_indices = @transform_4, window_bounds = array<i64: 1, 1, 8, 1>}, {transform_indices = @transform_5, window_bounds = array<i64: 1, 1, 8, 1>}, {transform_indices = @transform_6, window_bounds = array<i64: 8, 128>}, {transform_indices = @transform_7, window_bounds = array<i64: 1, 1, 8, 128>}, {transform_indices = @transform_8, window_bounds = array<i64: 1, 1, 8, 128>}]} {
    %c0_i32 = arith.constant 0 : i32
    %0 = arith.cmpi eq, %arg2, %c0_i32 : i32
    %1 = arith.extui %0 : i1 to i32
    %c0_i32_0 = arith.constant 0 : i32
    %2 = arith.cmpi ne, %1, %c0_i32_0 : i32
    scf.if %2 {
      %cst_37 = arith.constant 0.000000e+00 : f32
      %112 = vector.broadcast %cst_37 : f32 to vector<8x128xf32>
      %c0_38 = arith.constant 0 : index
      %c0_39 = arith.constant 0 : index
      %113 = vector.load %arg9[%c0_38, %c0_39] : memref<8x128xf32, #tpu.memory_space<vmem>>, vector<8x128xf32>
      tpu.vector_store %arg9[%c0_38, %c0_39], %112 {strides = array<i32>} : memref<8x128xf32, #tpu.memory_space<vmem>>, vector<8x128xf32>,
    } else {
    }
    %c0 = arith.constant 0 : index
    %c0_1 = arith.constant 0 : index
    %c0_2 = arith.constant 0 : index
    %3 = vector.load %arg3[%c0, %c0_1, %c0_2] : memref<1x1x128xf32, #tpu.memory_space<vmem>>, vector<1x1x128xf32>
    %4 = vector.shape_cast %3 : vector<1x1x128xf32> to vector<1x128xf32>
    %c0_3 = arith.constant 0 : index
    %c0_4 = arith.constant 0 : index
    %c0_5 = arith.constant 0 : index
    %5 = vector.load %arg4[%c0_3, %c0_4, %c0_5] : memref<1x12x1xf32, #tpu.memory_space<vmem>>, vector<1x12x1xf32>
    %6 = vector.shape_cast %5 : vector<1x12x1xf32> to vector<12x1xf32>
    %c0_6 = arith.constant 0 : index
    %c0_7 = arith.constant 0 : index
    %c0_8 = arith.constant 0 : index
    %c0_9 = arith.constant 0 : index
    %7 = vector.load %arg5[%c0_6, %c0_7, %c0_8, %c0_9] : memref<1x6x11x1xf32, #tpu.memory_space<vmem>>, vector<1x6x11x1xf32>
    %8 = vector.shape_cast %7 : vector<1x6x11x1xf32> to vector<6x11x1xf32>
    %9 = vector.extract_strided_slice %6 {offsets = [0, 0], sizes = [11, 1], strides = [1, 1]} : vector<12x1xf32> to vector<11x1xf32>
    %10 = vector.broadcast %4 : vector<1x128xf32> to vector<11x128xf32>
    %11 = vector.broadcast %9 : vector<11x1xf32> to vector<11x128xf32>
    %12 = arith.cmpf oge, %10, %11 : vector<11x128xf32>
    %13 = vector.extract_strided_slice %6 {offsets = [1, 0], sizes = [11, 1], strides = [1, 1]} : vector<12x1xf32> to vector<11x1xf32>
    %14 = vector.broadcast %4 : vector<1x128xf32> to vector<11x128xf32>
    %15 = vector.broadcast %13 : vector<11x1xf32> to vector<11x128xf32>
    %16 = arith.cmpf olt, %14, %15 : vector<11x128xf32>
    %17 = arith.andi %12, %16 : vector<11x128xi1>
    %cst = arith.constant 1.000000e+00 : f32
    %cst_10 = arith.constant 0.000000e+00 : f32
    %18 = vector.broadcast %cst : f32 to vector<11x128xf32>
    %19 = vector.broadcast %cst_10 : f32 to vector<11x128xf32>
    %20 = arith.select %17, %18, %19 : vector<11x128xi1>, vector<11x128xf32>
    %21 = vector.extract_strided_slice %8 {offsets = [0, 0, 0], sizes = [1, 10, 1], strides = [1, 1, 1]} : vector<6x11x1xf32> to vector<1x10x1xf32>
    %22 = vector.shape_cast %21 : vector<1x10x1xf32> to vector<10x1xf32>
    %23 = vector.extract_strided_slice %8 {offsets = [3, 0, 0], sizes = [1, 10, 1], strides = [1, 1, 1]} : vector<6x11x1xf32> to vector<1x10x1xf32>
    %24 = vector.shape_cast %23 : vector<1x10x1xf32> to vector<10x1xf32>
    %25 = vector.extract_strided_slice %6 {offsets = [0, 0], sizes = [10, 1], strides = [1, 1]} : vector<12x1xf32> to vector<10x1xf32>
    %26 = vector.broadcast %4 : vector<1x128xf32> to vector<10x128xf32>
    %27 = vector.broadcast %25 : vector<10x1xf32> to vector<10x128xf32>
    %28 = arith.subf %26, %27 : vector<10x128xf32>
    %29 = vector.broadcast %22 : vector<10x1xf32> to vector<10x128xf32>
    %30 = arith.mulf %28, %29 : vector<10x128xf32>
    %31 = vector.extract_strided_slice %6 {offsets = [2, 0], sizes = [10, 1], strides = [1, 1]} : vector<12x1xf32> to vector<10x1xf32>
    %32 = vector.broadcast %31 : vector<10x1xf32> to vector<10x128xf32>
    %33 = vector.broadcast %4 : vector<1x128xf32> to vector<10x128xf32>
    %34 = arith.subf %32, %33 : vector<10x128xf32>
    %35 = vector.broadcast %24 : vector<10x1xf32> to vector<10x128xf32>
    %36 = arith.mulf %34, %35 : vector<10x128xf32>
    %37 = vector.extract_strided_slice %20 {offsets = [0, 0], sizes = [10, 128], strides = [1, 1]} : vector<11x128xf32> to vector<10x128xf32>
    %38 = arith.mulf %30, %37 : vector<10x128xf32>
    %39 = vector.extract_strided_slice %20 {offsets = [1, 0], sizes = [10, 128], strides = [1, 1]} : vector<11x128xf32> to vector<10x128xf32>
    %40 = arith.mulf %36, %39 : vector<10x128xf32>
    %41 = arith.addf %38, %40 : vector<10x128xf32>
    %42 = vector.extract_strided_slice %8 {offsets = [1, 0, 0], sizes = [1, 9, 1], strides = [1, 1, 1]} : vector<6x11x1xf32> to vector<1x9x1xf32>
    %43 = vector.shape_cast %42 : vector<1x9x1xf32> to vector<9x1xf32>
    %44 = vector.extract_strided_slice %8 {offsets = [4, 0, 0], sizes = [1, 9, 1], strides = [1, 1, 1]} : vector<6x11x1xf32> to vector<1x9x1xf32>
    %45 = vector.shape_cast %44 : vector<1x9x1xf32> to vector<9x1xf32>
    %46 = vector.extract_strided_slice %6 {offsets = [0, 0], sizes = [9, 1], strides = [1, 1]} : vector<12x1xf32> to vector<9x1xf32>
    %47 = vector.broadcast %4 : vector<1x128xf32> to vector<9x128xf32>
    %48 = vector.broadcast %46 : vector<9x1xf32> to vector<9x128xf32>
    %49 = arith.subf %47, %48 : vector<9x128xf32>
    %50 = vector.broadcast %43 : vector<9x1xf32> to vector<9x128xf32>
    %51 = arith.mulf %49, %50 : vector<9x128xf32>
    %52 = vector.extract_strided_slice %6 {offsets = [3, 0], sizes = [9, 1], strides = [1, 1]} : vector<12x1xf32> to vector<9x1xf32>
    %53 = vector.broadcast %52 : vector<9x1xf32> to vector<9x128xf32>
    %54 = vector.broadcast %4 : vector<1x128xf32> to vector<9x128xf32>
    %55 = arith.subf %53, %54 : vector<9x128xf32>
    %56 = vector.broadcast %45 : vector<9x1xf32> to vector<9x128xf32>
    %57 = arith.mulf %55, %56 : vector<9x128xf32>
    %58 = vector.extract_strided_slice %41 {offsets = [0, 0], sizes = [9, 128], strides = [1, 1]} : vector<10x128xf32> to vector<9x128xf32>
    %59 = arith.mulf %51, %58 : vector<9x128xf32>
    %60 = vector.extract_strided_slice %41 {offsets = [1, 0], sizes = [9, 128], strides = [1, 1]} : vector<10x128xf32> to vector<9x128xf32>
    %61 = arith.mulf %57, %60 : vector<9x128xf32>
    %62 = arith.addf %59, %61 : vector<9x128xf32>
    %63 = vector.extract_strided_slice %8 {offsets = [2, 0, 0], sizes = [1, 8, 1], strides = [1, 1, 1]} : vector<6x11x1xf32> to vector<1x8x1xf32>
    %64 = vector.shape_cast %63 : vector<1x8x1xf32> to vector<8x1xf32>
    %65 = vector.extract_strided_slice %8 {offsets = [5, 0, 0], sizes = [1, 8, 1], strides = [1, 1, 1]} : vector<6x11x1xf32> to vector<1x8x1xf32>
    %66 = vector.shape_cast %65 : vector<1x8x1xf32> to vector<8x1xf32>
    %67 = vector.extract_strided_slice %6 {offsets = [0, 0], sizes = [8, 1], strides = [1, 1]} : vector<12x1xf32> to vector<8x1xf32>
    %68 = vector.broadcast %4 : vector<1x128xf32> to vector<8x128xf32>
    %69 = vector.broadcast %67 : vector<8x1xf32> to vector<8x128xf32>
    %70 = arith.subf %68, %69 : vector<8x128xf32>
    %71 = vector.broadcast %64 : vector<8x1xf32> to vector<8x128xf32>
    %72 = arith.mulf %70, %71 : vector<8x128xf32>
    %73 = vector.extract_strided_slice %6 {offsets = [4, 0], sizes = [8, 1], strides = [1, 1]} : vector<12x1xf32> to vector<8x1xf32>
    %74 = vector.broadcast %73 : vector<8x1xf32> to vector<8x128xf32>
    %75 = vector.broadcast %4 : vector<1x128xf32> to vector<8x128xf32>
    %76 = arith.subf %74, %75 : vector<8x128xf32>
    %77 = vector.broadcast %66 : vector<8x1xf32> to vector<8x128xf32>
    %78 = arith.mulf %76, %77 : vector<8x128xf32>
    %79 = vector.extract_strided_slice %62 {offsets = [0, 0], sizes = [8, 128], strides = [1, 1]} : vector<9x128xf32> to vector<8x128xf32>
    %80 = arith.mulf %72, %79 : vector<8x128xf32>
    %81 = vector.extract_strided_slice %62 {offsets = [1, 0], sizes = [8, 128], strides = [1, 1]} : vector<9x128xf32> to vector<8x128xf32>
    %82 = arith.mulf %78, %81 : vector<8x128xf32>
    %83 = arith.addf %80, %82 : vector<8x128xf32>
    %c0_11 = arith.constant 0 : index
    %c0_12 = arith.constant 0 : index
    %c0_13 = arith.constant 0 : index
    %c0_14 = arith.constant 0 : index
    %84 = vector.load %arg6[%c0_11, %c0_12, %c0_13, %c0_14] : memref<1x1x8x8xf32, #tpu.memory_space<vmem>>, vector<1x1x8x8xf32>
    %85 = vector.shape_cast %84 : vector<1x1x8x8xf32> to vector<8x8xf32>
    %cst_15 = arith.constant dense<0.000000e+00> : vector<8x128xf32>
    %86 = tpu.matmul %85, %83, %cst_15 {dimension_numbers = #tpu.dot_dimension_numbers<[1], [0], [0], [1], [0, 0, 1, 1], [], []>} : vector<8x8xf32>, vector<8x128xf32>, vector<8x128xf32> -> vector<8x128xf32>
    %87 = arith.negf %4 : vector<1x128xf32>
    %88 = math.exp %87 : vector<1x128xf32>
    %cst_16 = arith.constant 1.000000e+00 : f32
    %89 = vector.broadcast %cst_16 : f32 to vector<1x128xf32>
    %90 = arith.addf %89, %88 : vector<1x128xf32>
    %91 = arith.divf %89, %90 : vector<1x128xf32>
    %92 = arith.mulf %4, %91 : vector<1x128xf32>
    %c0_17 = arith.constant 0 : index
    %c0_18 = arith.constant 0 : index
    %c0_19 = arith.constant 0 : index
    %c0_20 = arith.constant 0 : index
    %93 = vector.load %arg7[%c0_17, %c0_18, %c0_19, %c0_20] : memref<1x1x8x1xf32, #tpu.memory_space<vmem>>, vector<1x1x8x1xf32>
    %94 = vector.shape_cast %93 : vector<1x1x8x1xf32> to vector<8x1xf32>
    %95 = vector.broadcast %94 : vector<8x1xf32> to vector<8x128xf32>
    %96 = vector.broadcast %92 : vector<1x128xf32> to vector<8x128xf32>
    %97 = arith.mulf %95, %96 : vector<8x128xf32>
    %c0_21 = arith.constant 0 : index
    %c0_22 = arith.constant 0 : index
    %c0_23 = arith.constant 0 : index
    %c0_24 = arith.constant 0 : index
    %98 = vector.load %arg8[%c0_21, %c0_22, %c0_23, %c0_24] : memref<1x1x8x1xf32, #tpu.memory_space<vmem>>, vector<1x1x8x1xf32>
    %99 = vector.shape_cast %98 : vector<1x1x8x1xf32> to vector<8x1xf32>
    %100 = vector.broadcast %99 : vector<8x1xf32> to vector<8x128xf32>
    %101 = arith.mulf %100, %86 : vector<8x128xf32>
    %102 = arith.addf %97, %101 : vector<8x128xf32>
    %c0_25 = arith.constant 0 : index
    %c0_26 = arith.constant 0 : index
    %103 = vector.load %arg9[%c0_25, %c0_26] : memref<8x128xf32, #tpu.memory_space<vmem>>, vector<8x128xf32>
    %104 = arith.addf %103, %102 : vector<8x128xf32>
    %c0_27 = arith.constant 0 : index
    %c0_28 = arith.constant 0 : index
    %105 = vector.load %arg9[%c0_27, %c0_28] : memref<8x128xf32, #tpu.memory_space<vmem>>, vector<8x128xf32>
    tpu.vector_store %arg9[%c0_27, %c0_28], %104 {strides = array<i32>} : memref<8x128xf32, #tpu.memory_space<vmem>>, vector<8x128xf32>,
    %c0_29 = arith.constant 0 : index
    %c0_30 = arith.constant 0 : index
    %c0_31 = arith.constant 0 : index
    %c0_32 = arith.constant 0 : index
    %106 = vector.load %arg10[%c0_29, %c0_30, %c0_31, %c0_32] : memref<1x1x8x128xf32, #tpu.memory_space<vmem>>, vector<1x1x8x128xf32>
    %107 = vector.shape_cast %106 : vector<1x1x8x128xf32> to vector<8x128xf32>
    %108 = vector.shape_cast %86 : vector<8x128xf32> to vector<1x1x8x128xf32>
    tpu.vector_store %arg10[%c0_29, %c0_30, %c0_31, %c0_32], %108 {strides = array<i32>} : memref<1x1x8x128xf32, #tpu.memory_space<vmem>>, vector<1x1x8x128xf32>,
    %c0_33 = arith.constant 0 : index
    %c0_34 = arith.constant 0 : index
    %c0_35 = arith.constant 0 : index
    %c0_36 = arith.constant 0 : index
    %109 = vector.load %arg11[%c0_33, %c0_34, %c0_35, %c0_36] : memref<1x1x8x128xf32, #tpu.memory_space<vmem>>, vector<1x1x8x128xf32>
    %110 = vector.shape_cast %109 : vector<1x1x8x128xf32> to vector<8x128xf32>
    %111 = vector.shape_cast %102 : vector<8x128xf32> to vector<1x1x8x128xf32>
    tpu.vector_store %arg11[%c0_33, %c0_34, %c0_35, %c0_36], %111 {strides = array<i32>} : memref<1x1x8x128xf32, #tpu.memory_space<vmem>>, vector<1x1x8x128xf32>,
    return
  }
  func.func @transform_0(%arg0: i32, %arg1: i32, %arg2: i32) -> (i32, i32, i32) {
    %c0_i32 = arith.constant 0 : i32
    %c0_i32_0 = arith.constant 0 : i32
    return %arg2, %c0_i32, %arg1 : i32, i32, i32
  }
  func.func @transform_1(%arg0: i32, %arg1: i32, %arg2: i32) -> (i32, i32, i32) {
    %c0_i32 = arith.constant 0 : i32
    %c0_i32_0 = arith.constant 0 : i32
    %c0_i32_1 = arith.constant 0 : i32
    return %arg2, %c0_i32, %c0_i32_0 : i32, i32, i32
  }
  func.func @transform_2(%arg0: i32, %arg1: i32, %arg2: i32) -> (i32, i32, i32, i32) {
    %c0_i32 = arith.constant 0 : i32
    %c0_i32_0 = arith.constant 0 : i32
    %c0_i32_1 = arith.constant 0 : i32
    %c0_i32_2 = arith.constant 0 : i32
    return %arg2, %c0_i32, %c0_i32_0, %c0_i32_1 : i32, i32, i32, i32
  }
  func.func @transform_3(%arg0: i32, %arg1: i32, %arg2: i32) -> (i32, i32, i32, i32) {
    %c0_i32 = arith.constant 0 : i32
    %c0_i32_0 = arith.constant 0 : i32
    %c0_i32_1 = arith.constant 0 : i32
    return %arg2, %arg0, %c0_i32, %c0_i32_0 : i32, i32, i32, i32
  }
  func.func @transform_4(%arg0: i32, %arg1: i32, %arg2: i32) -> (i32, i32, i32, i32) {
    %c0_i32 = arith.constant 0 : i32
    %c0_i32_0 = arith.constant 0 : i32
    %c0_i32_1 = arith.constant 0 : i32
    return %arg2, %arg0, %c0_i32, %c0_i32_0 : i32, i32, i32, i32
  }
  func.func @transform_5(%arg0: i32, %arg1: i32, %arg2: i32) -> (i32, i32, i32, i32) {
    %c0_i32 = arith.constant 0 : i32
    %c0_i32_0 = arith.constant 0 : i32
    %c0_i32_1 = arith.constant 0 : i32
    return %arg2, %arg0, %c0_i32, %c0_i32_0 : i32, i32, i32, i32
  }
  func.func @transform_6(%arg0: i32, %arg1: i32, %arg2: i32) -> (i32, i32) {
    %c0_i32 = arith.constant 0 : i32
    return %arg0, %arg1 : i32, i32
  }
  func.func @transform_7(%arg0: i32, %arg1: i32, %arg2: i32) -> (i32, i32, i32, i32) {
    %c0_i32 = arith.constant 0 : i32
    %c0_i32_0 = arith.constant 0 : i32
    return %arg2, %arg0, %c0_i32, %arg1 : i32, i32, i32, i32
  }
  func.func @transform_8(%arg0: i32, %arg1: i32, %arg2: i32) -> (i32, i32, i32, i32) {
    %c0_i32 = arith.constant 0 : i32
    %c0_i32_0 = arith.constant 0 : i32
    return %arg2, %arg0, %c0_i32, %arg1 : i32, i32, i32, i32
  }
}

</mosaic_0001>

<bundles_post_ra>
// kernel: tpu_custom_call.1
= control target key start
LH: loop header
LB: loop body
LE: loop exit
PB: predicated region body
PF: predicated region fallthrough
CT: control target
= control target key end

     0   :  { %s1542_s0 = inlined_call_operand.vmem [shape: f32[4,1,128], index: 0, kind: input, shape index: {}]   ;;  %s1543_s1 = inlined_call_operand.vmem [shape: f32[4,12,1], index: 1, kind: input, shape index: {}]   ;;  %s1544_s2 = inlined_call_operand.vmem [shape: f32[4,6,11,1], index: 2, kind: input, shape index: {}]   ;;  %s1545_s3 = inlined_call_operand.vmem [shape: f32[4,1,8,8], index: 3, kind: input, shape index: {}]   ;;  %s1546_s4 = inlined_call_operand.vmem [shape: f32[4,1,8,1], index: 4, kind: input, shape index: {}]   ;;  %s1547_s5 = inlined_call_operand.vmem [shape: f32[4,1,8,1], index: 5, kind: input, shape index: {}]   ;;  %s1548_s6 = inlined_call_operand.hbm [shape: f32[8,128], index: 6, kind: output, shape index: {0}]   ;;  %s1549_s7 = inlined_call_operand.hbm [shape: f32[4,1,8,128], index: 7, kind: output, shape index: {1}]   ;;  %s1550_s8 = inlined_call_operand.hbm [shape: f32[4,1,8,128], index: 8, kind: output, shape index: {2}]  }
   0x1   :  { %1557 = sst [smem:[#allocation14_spill]] %s1542_s0 }
   0x2   :  { %1558 = sst [smem:[#allocation15_spill]] %s1543_s1 }
   0x3   :  { %14 = vsyncpa [#allocation3], 0 }
   0x4   :  { %15 = vsyncpa [#allocation5], 0 }
   0x5   :  { %17 = vsyncpa [#allocation5 + $0x1], 0  ;;  %s1298_s27 = smov 0   ;;  %s1300_s28 = smov 0  }
   0x6   :  { %s1302_s29 = smov 0   ;;  %s1304_s30 = smov 0  }
   0x7   :  { %s1306_s9 = smov 0   ;;  %s1308_s10 = smov 0  }
   0x8 LB: > { %1559 = sst [smem:[#allocation9_spill]] %s1228_s28  ;;  %s1552_s11 = sadd.s32 4294967295, %s1244_s10   ;;  %s1244_s10 = sphi %s1308_s10, %s23_s10   ;;  %s1240_s9 = sphi %s1306_s9, %s1575_s9   ;;  %s1236_s30 = sphi %s1304_s30, %s1574_s30   ;;  %s1232_s29 = sphi %s1302_s29, %s1573_s29   ;;  %s1228_s28 = sphi %s1300_s28, %s1572_s28   ;;  %s1224_s27 = sphi %s1298_s27, %s1571_s27  }
   0x9   : > { %1560 = sst [smem:[#allocation10_spill]] %s1232_s29  ;;  %s1551_s12 = sadd.s32 4294967294, %s1244_s10  }
   0xa   : > { %1561 = sst [smem:[#allocation11_spill]] %s1240_s9  ;;  %s35_s13 = sadd.s32 1, %s1240_s9 }
   0xb   : > { %s245_s14 = sadd.s32 1, %s1232_s29  ;;  %p36_p0 = scmp.ge.s32.totalorder %s35_s13, 4 }
   0xc   : > { %p255_p1 = scmp.ne.s32.totalorder %s1232_s29, %s1228_s28  ;;  %p1334_p2 = scmp.eq.s32.totalorder %s1552_s11, 3 }
   0xd   : > { %p261_p3 = scmp.ne.s32.totalorder %s1228_s28, %s1224_s27  ;;  %s1577_s13 = smov (%p36_p0, %s35_s13), 0 }
   0xe   : > { %1563 = sst [smem:[#allocation12_spill]] %s1577_s13  ;;  %p1343_p4 = por %p1334_p2, %p255_p1 }
   0xf   : > { %p262_p5 = scmp.eq.s32.totalorder %s1551_s12, 3  ;;  %s238_s17 = ssub.s32 %s1240_s9, %s1577_s13 }
  0x10   : > { %p1008_p6 = scmp.ge.s32.totalorder %s1244_s10, 1  ;;  %p243_p7 = scmp.eq.s32.totalorder %s238_s17, 0 }
  0x11   : > { %p1352_p8 = por %p262_p5, %p261_p3  ;;  %p365_p9 = scmp.lt.s32.totalorder %s1244_s10, 5 }
  0x12   : > { %s1358_s19 = scalar_select %p243_p7, %s1232_s29, %s245_s14  }
  0x13   : > { %p366_p10 = pnand %p1008_p6, %p365_p9 }
  0x14   : > { %1566 = sst [smem:[#allocation13_spill]] %s1358_s19  ;;  %s426_s20 = sand.u32 (!%p366_p10), 1, %s1228_s28  }
  0x15   : > { %369 = sbr.rel (%p366_p10) target bundleno = 451 (0x1c3), region = 44  ;;  %p436_p11 = scmp.lt.s32.totalorder (!%p366_p10), %s1236_s30, 3 }
  0x16   : > { %s1362_s21 = sshll.u32 (!%p366_p10), %s426_s20, 3  ;;  %s1567_s0 = sld [smem:[#allocation14_spill]] (!%p366_p10) }
  0x17   : > { %s1568_s1 = sld [smem:[#allocation15_spill]] (!%p366_p10)  ;;  %s435_s28 = scalar_lea.vmem (!%p366_p10), [#allocation6], %s1362_s21 }
  0x18   : > { %p1017_p12 = scmp.ne.s32.totalorder (!%p366_p10), %s1236_s30, 0 }
  0x1a   : > { %s437_s22 = scalar_select %p436_p11, %s1236_s30, 3 }
  0x1c   : > { %s441_s25 = scalar_lea.vmem %s1567_s0, %s437_s22  ;;  %s1028_s26 = sshll.u32 %s437_s22, 4 }
  0x1d   : > { %s446_s17 = scalar_lea.vmem %s1568_s1, %s1028_s26  ;;  %s1036_s12 = smul.u32 96, %s437_s22 }
  0x1e   : > { %s1371_s11 = sshll.u32 %s437_s22, 3  ;;  %s428_s1 = scalar_lea.vmem [#allocation4], %s1362_s21 }
  0x1f   : > { %s1376_s20 = scalar_lea.vmem %s1544_s2, %s1036_s12  ;;  %s458_s23 = scalar_lea.vmem %s1545_s3, %s1371_s11 }
  0x20   : > { %s465_s27 = scalar_lea.vmem %s1546_s4, %s1371_s11  ;;  %s472_s22 = scalar_lea.vmem %s1547_s5, %s1371_s11 }
  0x21   : > { %476 = sbr.rel (%p1017_p12) target bundleno = 40 (0x28), region = 48 }
  0x26   : > { %v1246_v0 = vmov 0.0  }
  0x27   : > { %477 = vst [vmem:[#allocation2] sm:$0xff] %v1246_v0 }
  0x28 PF: > { %v486_v1 = vld [vmem:[%s1376_s20 + $0x30] sm:$0xff]  ;;  %v479_v2 = vld [vmem:[%s446_s17] sm:$0xff]  ;;  %v1247_v3 = vmov 0   ;;  %v487_v4 = vld [vmem:[%s1376_s20 + $0x38] sm:$0x7]  ;;  %v1248_v10 = vmov 0.0   ;;  %v492_v21 = vlaneseq }
  0x29   : > { %1109 = vset.pattern.permute.xlu1 %v1247_v3  ;;  %1108 = vset.pattern.permute.xlu0 %v1247_v3  ;;  %v480_v5 = vld [vmem:[%s446_s17 + $0x8] sm:$0xf]  ;;  %v478_v6 = vld [vmem:[%s441_s25] sm:$0x1]  ;;  %v484_v13 = vld [vmem:[%s1376_s20 + $0x18] sm:$0x7] }
  0x2a   : > { %541 = vperm.xlu1 %1109, %v486_v1   ;;  %499 = vperm.xlu0 %1108, %v479_v2   ;;  %v1019_v7 = vmul.f32 -1.442695, %v478_v6  ;;  %v482_v8 = vld [vmem:[%s1376_s20 + $0x8] sm:$0x7]  ;;  %v481_v9 = vld [vmem:[%s1376_s20] sm:$0xff]  ;;  %v483_v14 = vld [vmem:[%s1376_s20 + $0x10] sm:$0xff] }
  0x2b   : > { %1031 = vmatprep.subr.mxu0 %v1248_v10  ;;  %v489_v11 = vld [vmem:[%s1376_s20 + $0x48] sm:$0x7]  ;;  %v488_v12 = vld [vmem:[%s1376_s20 + $0x40] sm:$0xff]  ;;  %v490_v16 = vld [vmem:[%s1376_s20 + $0x50] sm:$0xff]  ;;  %v493_v22 = vshrl.u32 %v492_v21, 7  ;;  %vm1249_vm0 = vmmov 0  }
  0x2c   : > { %1110 = vpow2.f32 %v1019_v7  ;;  %v485_v15 = vld [vmem:[%s1376_s20 + $0x20] sm:$0xff]  ;;  %1033 = vmatprep.mubr.msk.f32.mxu0 %vm1249_vm0, %v1248_v10  ;;  %vm513_vm3 = vcmask 1046528   ;;  %vm547_vm4 = vcmask 1041408   ;;  %vm559_vm11 = vcmask 1040384   ;;  %s1569_s25 = sadd.s32 4294967295, %s1244_s10   ;;  %s1023_s20 = sshll.u32 %s1236_s30, 7 }
  0x2d   : > { %v753_v19 = vld [vmem:[%s472_s22] sm:$0xff]  ;;  %v494_v24 = vsub.s32 0, %v493_v22  ;;  %vm569_vm12 = vcmask 1045504   ;;  %vm597_vm13 = vcmask 1042432   ;;  %vm618_vm14 = vcmask 1044480   ;;  %s1426_s17 = sand.u32 1, %s1569_s25   ;;  %s1436_s14 = scalar_lea.hbm %s1549_s7, %s1023_s20 }
  0x2e   : > { %545 = vperm.xlu1 %1109, %v487_v4   ;;  %504 = vperm.xlu0 %1108, %v480_v5   ;;  %v740_v20 = vld [vmem:[%s465_s27] sm:$0xff]  ;;  %vm652_vm15 = vcmask 1043456   ;;  %vm659_vm0 = vcmask 64512   ;;  %s801_s24 = sshll.u32 %s428_s1, 4  ;;  %s1442_s11 = sshll.u32 %s435_s28, 4  ;;  %s1438_s24 = int_to_ptr.vmem [resolvable:$true] %s801_s24  ;;  %s817_s11 = int_to_ptr.vmem [resolvable:$true] %s1442_s11 }
  0x2f   : > { %v495_v27 = vrot.slane %v478_v6, %v494_v24  ;;  %s767_s0 = scalar_lea.sflag [#allocation5], %s1426_s17  ;;  %s1114_s29 = scalar_lea.vmem %s1438_s24, 128 }
  0x30   : > { %p1115_p13 = scmp.ne.s32.totalorder %s1438_s24, %s1114_s29  ;;  %s1251_s9 = smov [#allocation4]  }
  0x31   : > { %s1118_s12 = sshll.u32 %s1251_s9, 4  ;;  %s1119_s12 = int_to_ptr.vmem [resolvable:$false] %s1118_s12 }
  0x32   : > { %532 = vperm.xlu1 %1109, %v482_v8   ;;  %527 = vperm.xlu0 %1108, %v481_v9   ;;  %p1116_p0 = pnand %p1115_p13, %p1343_p4  ;;  %s1120_s13 = scalar_lea.vmem %s1119_s12, 256 }
  0x33   : > { %p1121_p3 = scmp.lt.s32.totalorder %s1438_s24, %s1119_s12  ;;  %p1122_p5 = scmp.lt.s32.totalorder %s1120_s13, %s1114_s29 }
  0x34   : > { %p1117_p1 = pneg %p1116_p0 }
  0x35   : > { %p1123_p6 = por %p1122_p5, %p1121_p3 }
  0x36   : > { %595 = vperm.xlu1 %1109, %v489_v11   ;;  %591 = vperm.xlu0 %1108, %v488_v12  }
  0x37   : > { %p1124_p7 = pnand %p1123_p6, %p1117_p1 }
  0x39   : > { %v1111_v17 = vpop.eup %1110 }
  0x3a   : > { %584 = vperm.xlu1 %1109, %v484_v13   ;;  %579 = vperm.xlu0 %1108, %v483_v14   ;;  %v736_v18 = vadd.f32 1.0, %v1111_v17 }
  0x3c   : > { %1112 = vrcp.f32 %v736_v18 }
  0x3e   : > { %628 = vperm.xlu1 %1109, %v485_v15   ;;  %634 = vperm.xlu0 %1108, %v490_v16  }
  0x42   : > { %756 = vperm.xlu1 %1109, %v753_v19   ;;  %743 = vperm.xlu0 %1108, %v740_v20  }
  0x49   : > { %v1113_v23 = vpop.eup %1112 }
  0x4a   : > { %v739_v25 = vmul.f32 %v1113_v23, %v478_v6 }
  0x4c   : > { %v1413_v26 = vrot.slane %v739_v25, %v494_v24 }
  0xa5   : > { %v542_v28 = vpop.permute.xlu1 %541  ;;  %v500_v29 = vpop.permute.xlu0 %499 }
  0xa6   : > { %vm509_vm1 = vcmp.lt.f32.partialorder %v495_v27, %v500_v29  ;;  %v548_v37 = vrot.slane %v542_v28, 6  ;;  %v537_v40 = vsub.f32 %v500_v29, %v495_v27  ;;  %vm507_vm8 = vcmp.ge.f32.partialorder %v495_v27, %v500_v29 }
  0xa7   : > { %v511_v30 = vsel %vm509_vm1, 1, %v1247_v3  ;;  %v523_v54 = vsub.f32 %v495_v27, %v500_v29 }
  0xa8   : > { %v514_v34 = vrot.slane %v511_v30, 1  ;;  %v553_v48 = vmul.f32 %v548_v37, %v537_v40 }
  0xa9   : > { %v546_v31 = vpop.permute.xlu1 %545  ;;  %v505_v32 = vpop.permute.xlu0 %504 }
  0xaa   : > { %vm510_vm2 = vcmp.lt.f32.partialorder %v495_v27, %v505_v32  ;;  %v549_v35 = vrot.slane %v546_v31, 6  ;;  %vm508_vm5 = vcmp.ge.f32.partialorder %v495_v27, %v505_v32  ;;  %v538_v42 = vsub.f32 %v505_v32, %v495_v27 }
  0xab   : > { %v512_v33 = vsel %vm510_vm2, 1, %v1247_v3  ;;  %v524_v45 = vsub.f32 %v495_v27, %v505_v32 }
  0xac   : > { %v515_v36 = vrot.slane %v512_v33, 1  ;;  %v550_v43 = vsel %vm547_vm4, %v548_v37, %v549_v35 }
  0xad   : > { %v533_v38 = vpop.permute.xlu1 %532  ;;  %v528_v39 = vpop.permute.xlu0 %527  ;;  %v554_v50 = vmul.f32 %v550_v43, %v538_v42 }
  0xae   : > { %vm518_vm6 = vcmp.ne.s32.totalorder %v515_v36, 0  ;;  %v516_v41 = vsel %vm513_vm3, %v514_v34, %v515_v36  ;;  %v536_v51 = vmul.f32 %v533_v38, %v524_v45  ;;  %v535_v58 = vmul.f32 %v528_v39, %v523_v54 }
  0xaf   : > { %vm520_vm7 = vmand %vm508_vm5, %vm518_vm6  ;;  %vm517_vm9 = vcmp.ne.s32.totalorder %v516_v41, 0 }
  0xb0   : > { %v522_v44 = vsel %vm520_vm7, 1.0, %v1248_v10  ;;  %vm519_vm10 = vmand %vm507_vm8, %vm517_vm9 }
  0xb1   : > { %v561_v46 = vrot.slane %v522_v44, 7  ;;  %v521_v47 = vsel %vm519_vm10, 1.0, %v1248_v10  ;;  %v596_v52 = vpop.permute.xlu1 %595  ;;  %v592_v53 = vpop.permute.xlu0 %591  ;;  %v556_v62 = vmul.f32 %v536_v51, %v522_v44 }
  0xb2   : > { %v560_v49 = vrot.slane %v521_v47, 7  ;;  %v599_v60 = vrot.slane %v596_v52, 5  ;;  %v598_v61 = vrot.slane %v592_v53, 5  ;;  %v555_v0 = vmul.f32 %v535_v58, %v521_v47 }
  0xb4   : > { %v562_v55 = vsel %vm559_vm11, %v560_v49, %v561_v46  ;;  %v565_v56 = vmul.f32 %v560_v49, %v553_v48  ;;  %v600_v5 = vsel %vm597_vm13, %v598_v61, %v599_v60  ;;  %v603_v7 = vmul.f32 %v598_v61, %v537_v40 }
  0xb5   : > { %v566_v57 = vmul.f32 %v562_v55, %v554_v50  ;;  %v580_v3 = vpop.permute.xlu0 %579  ;;  %v585_v9 = vpop.permute.xlu1 %584  ;;  %v604_v10 = vmul.f32 %v600_v5, %v538_v42 }
  0xb6   : > { %v570_v59 = vrot.slane %v565_v56, 2  ;;  %v588_v13 = vmul.f32 %v585_v9, %v524_v45  ;;  %v587_v17 = vmul.f32 %v580_v3, %v523_v54 }
  0xb7   : > { %v571_v63 = vrot.slane %v566_v57, 2 }
  0xb9   : > { %v572_v1 = vsel %vm569_vm12, %v570_v59, %v571_v63  ;;  %v576_v2 = vadd.f32 %v571_v63, %v556_v62  ;;  %v635_v15 = vpop.permute.xlu0 %634  ;;  %v629_v29 = vpop.permute.xlu1 %628 }
  0xba   : > { %v575_v4 = vadd.f32 %v572_v1, %v555_v0  ;;  %v636_v21 = vrot.slane %v635_v15, 4  ;;  %v631_v34 = vmul.f32 %v629_v29, %v523_v54 }
  0xbb   : > { %v610_v6 = vrot.slane %v576_v2, 6  ;;  %v606_v18 = vmul.f32 %v588_v13, %v576_v2 }
  0xbc   : > { %v609_v8 = vrot.slane %v575_v4, 6  ;;  %v605_v20 = vmul.f32 %v587_v17, %v575_v4  ;;  %v638_v27 = vmul.f32 %v636_v21, %v537_v40  ;;  %v639_v30 = vmul.f32 %v636_v21, %v538_v42  ;;  %v658_v40 = vld [vmem:[%s458_s23] sm:$0xff]  ;;  %s1250_s23 = smov [#allocation2]  }
  0xbd   : > { %v744_v41 = vpop.permute.xlu0 %743  ;;  %v757_v42 = vpop.permute.xlu1 %756  ;;  %s1447_s22 = sshll.u32 %s1250_s23, 4  ;;  %s1483_s22 = int_to_ptr.vmem [resolvable:$true] %s1447_s22 }
  0xbe   : > { %v614_v11 = vmul.f32 %v609_v8, %v603_v7  ;;  %v611_v12 = vsel %vm547_vm4, %v609_v8, %v610_v6  ;;  %v752_v44 = vmul.f32 %v1413_v26, %v744_v41 }
  0xbf   : > { %v615_v14 = vmul.f32 %v611_v12, %v604_v10 }
  0xc0   : > { %v619_v16 = vrot.slane %v614_v11, 3 }
  0xc1   : > { %v620_v19 = vrot.slane %v615_v14, 3 }
  0xc3   : > { %v625_v22 = vadd.f32 %v620_v19, %v606_v18  ;;  %v621_v23 = vsel %vm618_vm14, %v619_v16, %v620_v19 }
  0xc4   : > { %v624_v24 = vadd.f32 %v621_v23, %v605_v20 }
  0xc5   : > { %v644_v25 = vrot.slane %v625_v22, 5 }
  0xc6   : > { %v643_v28 = vrot.slane %v624_v24, 5  ;;  %v640_v37 = vmul.f32 %v631_v34, %v624_v24 }
  0xc8   : > { %v645_v31 = vsel %vm597_vm13, %v643_v28, %v644_v25  ;;  %v648_v32 = vmul.f32 %v643_v28, %v638_v27 }
  0xc9   : > { %v649_v33 = vmul.f32 %v645_v31, %v639_v30 }
  0xca   : > { %v653_v35 = vrot.slane %v648_v32, 4 }
  0xcb   : > { %v654_v36 = vrot.slane %v649_v33, 4 }
  0xcd   : > { %v655_v38 = vsel %vm652_vm15, %v653_v35, %v654_v36 }
  0xce   : > { %v657_v39 = vadd.f32 %v655_v38, %v640_v37 }
  0xd0   : > { %1032 = vmatpush3.msra.mxu0 %v657_v39 }
  0xd1   : > { %1034 = vmatmul.mubr.msk.f32.vlgmr.msra.gmra.mxu0 %vm659_vm0, %v658_v40 }
 0x191   : > { %v729_v43 = vpop.f32.mrf.mxu0 }
 0x192   : > { %v759_v45 = vmul.f32 %v757_v42, %v729_v43  ;;  %764 = vst [vmem:[%s428_s1] sm:$0xff] %v729_v43 }
 0x193   : > { %v1035_v46 = vpop.f32.mrf.mxu0 }
 0x194   : > { %1127 = shalt.err (!%p1124_p7)
}
 0x195   : > { %s1128_s1 = scalar_lea.hbm %s1436_s14, 128  ;;  %s1132_s27 = scalar_lea.hbm %s1549_s7, 512 }
 0x196   : > { %p1129_p9 = scmp.ne.s32.totalorder %s1436_s14, %s1128_s1  ;;  %p1133_p12 = scmp.lt.s32.totalorder %s1436_s14, %s1549_s7 }
 0x197   : > { %p1134_p13 = scmp.lt.s32.totalorder %s1132_s27, %s1128_s1 }
 0x198   : > { %p1130_p10 = pnand %p1129_p9, %p1343_p4 }
 0x199   : > { %p1135_p0 = por %p1134_p13, %p1133_p12 }
 0x19a   : > { %p1131_p11 = pneg %p1130_p10 }
 0x19c   : > { %p1136_p1 = pnand %p1135_p0, %p1131_p11 }
 0x19e   : > { %1139 = shalt.err (!%p1136_p1)
}
 0x19f   : > { %1039 = dma.vmem_to_hbm [thread:$0]  (%p1343_p4), %s1438_s24, 128, %s1436_s14, %s767_s0   ;;  %v761_v26 = vld [vmem:[#allocation2] sm:$0xff]  ;;  %v760_v47 = vadd.f32 %v759_v45, %v752_v44 }
 0x1a0   : > { %s1477_s12 = scalar_lea.hbm %s1550_s8, %s1023_s20  ;;  %s1140_s13 = scalar_lea.vmem %s817_s11, 128 }
 0x1a1   : > { %765 = vst [vmem:[%s435_s28] sm:$0xff] %v760_v47  ;;  %v762_v48 = vadd.f32 %v761_v26, %v760_v47  ;;  %p1141_p3 = scmp.ne.s32.totalorder %s817_s11, %s1140_s13  ;;  %s1252_s24 = smov [#allocation6]  }
 0x1a2   : > { %s1144_s14 = sshll.u32 %s1252_s24, 4  ;;  %s1145_s14 = int_to_ptr.vmem [resolvable:$false] %s1144_s14 }
 0x1a3   : > { %p1142_p5 = pnand %p1141_p3, %p1343_p4  ;;  %s1146_s30 = scalar_lea.vmem %s1145_s14, 256 }
 0x1a4   : > { %p1147_p7 = scmp.lt.s32.totalorder %s817_s11, %s1145_s14  ;;  %p1148_p9 = scmp.lt.s32.totalorder %s1146_s30, %s1140_s13 }
 0x1a5   : > { %p1143_p6 = pneg %p1142_p5 }
 0x1a6   : > { %p1149_p10 = por %p1148_p9, %p1147_p7 }
 0x1a8   : > { %p1150_p11 = pnand %p1149_p10, %p1143_p6 }
 0x1aa   : > { %1153 = shalt.err (!%p1150_p11)
}
 0x1ab   : > { %s1154_s28 = scalar_lea.hbm %s1477_s12, 128  ;;  %s1158_s1 = scalar_lea.hbm %s1550_s8, 512 }
 0x1ac   : > { %p1155_p12 = scmp.ne.s32.totalorder %s1477_s12, %s1154_s28  ;;  %p1159_p1 = scmp.lt.s32.totalorder %s1477_s12, %s1550_s8 }
 0x1ad   : > { %p1160_p3 = scmp.lt.s32.totalorder %s1158_s1, %s1154_s28 }
 0x1ae   : > { %p1156_p13 = pnand %p1155_p12, %p1343_p4 }
 0x1af   : > { %p1161_p5 = por %p1160_p3, %p1159_p1 }
 0x1b0   : > { %p1157_p0 = pneg %p1156_p13 }
 0x1b2   : > { %p1162_p6 = pnand %p1161_p5, %p1157_p0 }
 0x1b4   : > { %1165 = shalt.err (!%p1162_p6)
}
 0x1b5   : > { %1040 = dma.vmem_to_hbm [thread:$0]  (%p1343_p4), %s817_s11, 128, %s1477_s12, %s767_s0   ;;  %763 = vst [vmem:[#allocation2] sm:$0xff] %v762_v48 }
 0x1b6   : > { %s1166_s27 = scalar_lea.vmem %s1483_s22, 128  ;;  %p1173_p11 = scmp.lt.s32.totalorder %s1483_s22, %s1483_s22 }
 0x1b7   : > { %p1167_p7 = scmp.ne.s32.totalorder %s1483_s22, %s1166_s27  ;;  %p1174_p12 = scmp.lt.s32.totalorder %s1166_s27, %s1166_s27 }
 0x1b9   : > { %p1168_p9 = pnand %p1167_p7, %p1334_p2  ;;  %p1175_p13 = por %p1174_p12, %p1173_p11 }
 0x1bb   : > { %p1169_p10 = pneg %p1168_p9 }
 0x1bd   : > { %p1176_p0 = pnand %p1175_p13, %p1169_p10 }
 0x1bf   : > { %1179 = shalt.err (!%p1176_p0)
}
 0x1c0   : > { %1038 = dma.vmem_to_hbm [thread:$0]  (%p1334_p2), %s1483_s22, 128, %s1548_s6, [#allocation3]  }
 0x1c1   : > { %1215 = dma.done.wait (%p1334_p2), [#allocation3], 128  }
 0x1c2   : > { %1217 = vsyncadd (%p1334_p2), [#allocation3], 4294967168 }
 0x1c3 PF: > { %p1054_p4 = scmp.ge.s32.totalorder %s1244_s10, 2  ;;  %s1570_s11 = sadd.s32 4294967294, %s1244_s10  }
 0x1c4   : > { %s832_s0 = sand.u32 1, %s1570_s11  }
 0x1c5   : > { %p1046_p1 = pnand %p1054_p4, %p1352_p8  ;;  %s833_s26 = scalar_lea.sflag [#allocation5], %s832_s0 }
 0x1c7   : > { %p1047_p3 = pneg %p1046_p1 }
 0x1c9   : > { %1219 = dma.done.wait (%p1047_p3), %s833_s26, 256  }
 0x1ca   : > { %1221 = vsyncadd (%p1047_p3), %s833_s26, 4294967040  ;;  %s23_s10 = sadd.s32 1, %s1244_s10   ;;  %s1571_s27 = sld [smem:[#allocation9_spill]] }
 0x1cb   : > { %p20_p5 = scmp.ge.s32.totalorder %s23_s10, 6   ;;  %s1572_s28 = sld [smem:[#allocation10_spill]] }
 0x1cc   : > { %s1573_s29 = sld [smem:[#allocation13_spill]] }
 0x1cd   : > { %s1574_s30 = sld [smem:[#allocation11_spill]]  ;;  %22 = sbr.rel (!%p20_p5) target bundleno = 8 (0x8), region = 123 }
 0x1ce   : > { %s1575_s9 = sld [smem:[#allocation12_spill]] }
 0x1d2   :  { %847 = vsyncpa [#allocation3], 1 }
 0x1d3   :  { %849 = vsyncpa [#allocation3 + $0x1], 1 }
 0x1d4   :  { %850 = vsyncpa [#allocation5], 1 }
 0x1d5   :  { %852 = vsyncpa [#allocation5 + $0x1], 1 }

</bundles_post_ra>
